<compile_context>
chip_gen: v7x
topology: tpu7x:2x2x1
jax: 0.10.0
libtpu: 0.0.40
codegen_flags: <defaults>
</compile_context>

<pallas_src>
import functools

import numpy as np
import jax
import jax.numpy as jnp
from jax import lax
from jax.experimental import pallas as pl
from jax.experimental.pallas import tpu as pltpu


_NEG_PAD = -1e30      # pad lifetime: never wins top-k, clamps to 0 contribution
_N_DIMS = 3           # homology dimensions 0..2
_SUBLANES = 8         # slab rows (one vreg worth of sublanes)
_OUT_LANES = 128      # lane-dense output width


# ----------------------------------------------------------------------------
# Pallas kernel
# ----------------------------------------------------------------------------
def _int_pow(x, m):
    """x ** m for positive integer m via repeated multiply (stays on the VPU)."""
    acc = x
    for _ in range(m - 1):
        acc = acc * x
    return acc


def _totpers_loss_kernel(slab_ref, out_ref, *, k, m):
    """Top-k-longest-bars total persistence per homology dim + squared loss.

    slab_ref : (8, n_pad) f32 VMEM
               rows 0-2 : lifetimes per dim (pads = -1e30)
               rows 3-5 : per-dim data totals at lane 0
               rows 6-7 : pad
    out_ref  : (8, 128)  f32 VMEM
               rows 0-2 : per-dim total persistence (broadcast along lanes)
               row  3   : scalar loss (broadcast along lanes)
               rows 4-7 : 0
    """
    buf = slab_ref[...]                                      # (8, n_pad) f32

    # Unique int32 sort keys: nonnegative f32 bit patterns are monotone as
    # int32; clear the low 7 mantissa bits and pack the lane index there so
    # every entry in a row has a distinct key (exact duplicate lifetimes get
    # distinct keys -> both can be selected, matching argsort semantics).
    lane = lax.broadcasted_iota(jnp.int32, buf.shape, 1)     # hoisted
    bits = pltpu.bitcast(buf, jnp.int32)
    keys = (bits & jnp.int32(-128)) | lane                   # unique per row
    knock = jnp.full(buf.shape, jnp.iinfo(jnp.int32).min, jnp.int32)  # hoisted
    sel = jnp.zeros(buf.shape, jnp.bool_)

    # Statically unrolled top-k: ONE cross-lane reduction per step (serial
    # chain of k XLU maxes, vs. 2k max+min previously).  All carries stay
    # vector-shaped; pads / exhausted rows resolve to keys < any valid key.
    for _ in range(k):
        cur = jnp.max(keys, axis=-1, keepdims=True)          # (8, 1) int32
        hit = keys == cur                                    # one live hit/row
        sel = jnp.logical_or(sel, hit)
        keys = jnp.where(hit, knock, keys)

    # Exact contributions from the original f32 values; pads / negative
    # lifetimes clamp to 0 so exhausted rows add nothing.
    clamped = jnp.maximum(buf, jnp.float32(0.0))
    if isinstance(m, int) and m >= 1:
        powed = _int_pow(clamped, m)                         # VPU multiplies
    else:
        powed = clamped ** jnp.float32(m)                    # EUP fallback
    contrib = jnp.where(sel, powed, jnp.float32(0.0))
    acc = jnp.sum(contrib, axis=-1, keepdims=True)           # (8, 1)

    # Squared loss against the data totals carried in rows 3..5, lane 0.
    data_tot = buf[3:3 + _N_DIMS, 0:1]                       # (3, 1)
    diff = acc[0:_N_DIMS, :] - data_tot                      # (3, 1)
    loss = jnp.sum(diff * diff, keepdims=True)               # (1, 1)

    # One lane-dense (8, 128) store.
    row = lax.broadcasted_iota(jnp.int32, (_SUBLANES, _OUT_LANES), 0)
    out_ref[...] = jnp.where(
        row < _N_DIMS, acc,
        jnp.where(row == _N_DIMS, loss, jnp.float32(0.0)))


@functools.lru_cache(maxsize=None)
def _build_totpers_call(batch, n_pad, k, m):
    kernel = functools.partial(_totpers_loss_kernel, k=k, m=m)
    return pl.pallas_call(
        kernel,
        out_shape=jax.ShapeDtypeStruct((batch, _SUBLANES, _OUT_LANES),
                                       jnp.float32),
        grid=(batch,),
        in_specs=[pl.BlockSpec((None, _SUBLANES, n_pad), lambda b: (b, 0, 0))],
        out_specs=pl.BlockSpec((None, _SUBLANES, _OUT_LANES),
                               lambda b: (b, 0, 0)),
        compiler_params=pltpu.CompilerParams(
            dimension_semantics=("parallel",)),   # v7x: shard samples over TCs
    )


def total_persistence_batched(slabs, *, k, m):
    """slabs: (B, 8, n_pad) f32. Returns (tot (B, 3), loss (B,))."""
    batch, sub, n_pad = slabs.shape
    assert sub == _SUBLANES
    out = _build_totpers_call(batch, n_pad, k, m)(slabs)
    return out[:, 0:_N_DIMS, 0], out[:, _N_DIMS, 0]


# ----------------------------------------------------------------------------
# Glue (jnp, device-side): lifetime packing + the module wrapper
# ----------------------------------------------------------------------------
def pack_sample(dgms, data_tot=None, n_pad=128):
    """Pack one sample's diagrams (post-AlphaLayer) into an (8, n_pad) slab."""
    slab = jnp.full((_SUBLANES, n_pad), _NEG_PAD, jnp.float32)
    for i, dgm in enumerate(dgms):
        dgm = jnp.asarray(dgm, jnp.float32)[max(1 - i, 0):]   # same skip as ref
        n = int(dgm.shape[0])
        if n > n_pad:
            raise ValueError(f"diagram {i} has {n} bars > n_pad={n_pad}")
        if n:
            slab = slab.at[i, :n].set(dgm[:, 1] - dgm[:, 0])
    dt = (jnp.zeros((_N_DIMS,), jnp.float32) if data_tot is None
          else jnp.asarray(data_tot, jnp.float32))
    slab = slab.at[3:3 + _N_DIMS, 0].set(dt)
    return slab


class TotalPersistenceLossTPU:
    """JAX/Pallas port of TotalPersistenceLoss (downstream of AlphaLayer)."""

    def __init__(self, data_dgms, k, m, n_pad=128):
        self.k = int(k)
        # keep the VPU integer-power path whenever m is integer-valued
        self.m = int(m) if float(m) == int(m) else float(m)
        self.n_pad = n_pad
        slab = pack_sample(data_dgms, None, n_pad)[None]       # (1, 8, n_pad)
        tot, _ = total_persistence_batched(slab, k=self.k, m=self.m)
        self.data_tot_pers = tot[0]                            # (3,)

    def __call__(self, emb_dgms):
        slab = pack_sample(emb_dgms, self.data_tot_pers, self.n_pad)[None]
        _, loss = total_persistence_batched(slab, k=self.k, m=self.m)
        return loss[0]

    def batched(self, list_of_emb_dgms):
        """Many samples per pallas_call (amortizes launch/DMA overhead)."""
        slabs = jnp.stack([pack_sample(d, self.data_tot_pers, self.n_pad)
                           for d in list_of_emb_dgms], axis=0)
        _, loss = total_persistence_batched(slabs, k=self.k, m=self.m)
        return loss


# ----------------------------------------------------------------------------
# Deterministic synthetic diagrams (stand-in for AlphaLayer output)
# ----------------------------------------------------------------------------
def synth_diagrams(key, sizes=(21, 12, 6)):
    dgms = []
    for i, n in enumerate(sizes):
        key, k1, k2 = jax.random.split(key, 3)
        b = jax.random.uniform(k1, (n,), jnp.float32, 0.0, 1.0)
        life = jax.random.uniform(k2, (n,), jnp.float32, 0.0, 0.5)
        d = b + life
        if i == 0:
            d = d.at[0].set(1e6)  # mimic the (skipped) infinite dim-0 bar
        dgms.append(jnp.stack([b, d], axis=1))
    return dgms, key


def _ref_tot_pers(dgm, i, k, m):
    d = np.asarray(dgm, np.float32)[max(1 - i, 0):]
    life = d[:, 1] - d[:, 0]
    top = np.sort(life)[-k:]
    return float(np.sum(top.astype(np.float64) ** m))


if __name__ == "__main__":
    key = jax.random.PRNGKey(0)
    k, m = 5, 2

    data_dgms, key = synth_diagrams(key, sizes=(21, 12, 6))
    emb_dgms, key = synth_diagrams(key, sizes=(21, 12, 6))
    # exact duplicate lifetime in dim-1 to exercise tie handling
    emb_dgms[1] = emb_dgms[1].at[3, :].set(emb_dgms[1][2, :])

    module = TotalPersistenceLossTPU(data_dgms, k=k, m=m, n_pad=128)
    loss = jax.block_until_ready(module(emb_dgms))

    # Pure-numpy reference of the same forward semantics.
    data_ref = [_ref_tot_pers(data_dgms[i], i, k, m) for i in range(3)]
    emb_ref = [_ref_tot_pers(emb_dgms[i], i, k, m) for i in range(3)]
    loss_ref = sum((emb_ref[i] - data_ref[i]) ** 2 for i in range(3))
    np.testing.assert_allclose(float(loss), loss_ref, rtol=5e-3, atol=1e-6)

    # Batched path (grid over samples, "parallel" axis for v7x megacore).
    losses = jax.block_until_ready(module.batched([emb_dgms, emb_dgms]))
    np.testing.assert_allclose(np.asarray(losses), [loss_ref, loss_ref],
                               rtol=5e-3, atol=1e-6)

    print("KERNEL_OK")
</pallas_src>

<mosaic_0001>
module attributes {stable_mosaic.version = 11 : i64} {
  func.func @_totpers_loss_kernel(%arg0: i32, %arg1: memref<1x8x128xf32, #tpu.memory_space<vmem>>, %arg2: memref<1x8x128xf32, #tpu.memory_space<vmem>>) attributes {dimension_semantics = [#tpu.dimension_semantics<parallel>], iteration_bounds = array<i64: 1>, scalar_prefetch = 0 : i64, scratch_operands = 0 : i64, tpu.core_type = #tpu.core_type<tc>, window_params = [{transform_indices = @transform_0, window_bounds = array<i64: 1, 8, 128>}, {transform_indices = @transform_1, window_bounds = array<i64: 1, 8, 128>}]} {
    %c0 = arith.constant 0 : index
    %c0_0 = arith.constant 0 : index
    %c0_1 = arith.constant 0 : index
    %0 = vector.load %arg1[%c0, %c0_0, %c0_1] : memref<1x8x128xf32, #tpu.memory_space<vmem>>, vector<1x8x128xf32>
    %1 = vector.shape_cast %0 : vector<1x8x128xf32> to vector<8x128xf32>
    %2 = tpu.iota {dimensions = array<i32: 1>} : vector<8x128xi32>
    %3 = tpu.bitcast %1 : vector<8x128xf32> -> vector<8x128xi32>
    %c-128_i32 = arith.constant -128 : i32
    %4 = vector.broadcast %c-128_i32 : i32 to vector<8x128xi32>
    %5 = arith.andi %3, %4 : vector<8x128xi32>
    %6 = arith.ori %5, %2 : vector<8x128xi32>
    %c-2147483648_i32 = arith.constant -2147483648 : i32
    %7 = vector.broadcast %c-2147483648_i32 : i32 to vector<8x128xi32>
    %false = arith.constant false
    %8 = vector.broadcast %false : i1 to vector<8x128xi1>
    %cst = arith.constant dense<-2147483648> : vector<8xi32>
    %9 = vector.multi_reduction <maxsi>, %6, %cst [1] : vector<8x128xi32> to vector<8xi32>
    %10 = vector.shape_cast %9 : vector<8xi32> to vector<8x1xi32>
    %11 = vector.broadcast %10 : vector<8x1xi32> to vector<8x128xi32>
    %12 = arith.cmpi eq, %6, %11 : vector<8x128xi32>
    %13 = arith.ori %8, %12 : vector<8x128xi1>
    %14 = arith.select %12, %7, %6 : vector<8x128xi1>, vector<8x128xi32>
    %cst_2 = arith.constant dense<-2147483648> : vector<8xi32>
    %15 = vector.multi_reduction <maxsi>, %14, %cst_2 [1] : vector<8x128xi32> to vector<8xi32>
    %16 = vector.shape_cast %15 : vector<8xi32> to vector<8x1xi32>
    %17 = vector.broadcast %16 : vector<8x1xi32> to vector<8x128xi32>
    %18 = arith.cmpi eq, %14, %17 : vector<8x128xi32>
    %19 = arith.ori %13, %18 : vector<8x128xi1>
    %20 = arith.select %18, %7, %14 : vector<8x128xi1>, vector<8x128xi32>
    %cst_3 = arith.constant dense<-2147483648> : vector<8xi32>
    %21 = vector.multi_reduction <maxsi>, %20, %cst_3 [1] : vector<8x128xi32> to vector<8xi32>
    %22 = vector.shape_cast %21 : vector<8xi32> to vector<8x1xi32>
    %23 = vector.broadcast %22 : vector<8x1xi32> to vector<8x128xi32>
    %24 = arith.cmpi eq, %20, %23 : vector<8x128xi32>
    %25 = arith.ori %19, %24 : vector<8x128xi1>
    %26 = arith.select %24, %7, %20 : vector<8x128xi1>, vector<8x128xi32>
    %cst_4 = arith.constant dense<-2147483648> : vector<8xi32>
    %27 = vector.multi_reduction <maxsi>, %26, %cst_4 [1] : vector<8x128xi32> to vector<8xi32>
    %28 = vector.shape_cast %27 : vector<8xi32> to vector<8x1xi32>
    %29 = vector.broadcast %28 : vector<8x1xi32> to vector<8x128xi32>
    %30 = arith.cmpi eq, %26, %29 : vector<8x128xi32>
    %31 = arith.ori %25, %30 : vector<8x128xi1>
    %32 = arith.select %30, %7, %26 : vector<8x128xi1>, vector<8x128xi32>
    %cst_5 = arith.constant dense<-2147483648> : vector<8xi32>
    %33 = vector.multi_reduction <maxsi>, %32, %cst_5 [1] : vector<8x128xi32> to vector<8xi32>
    %34 = vector.shape_cast %33 : vector<8xi32> to vector<8x1xi32>
    %35 = vector.broadcast %34 : vector<8x1xi32> to vector<8x128xi32>
    %36 = arith.cmpi eq, %32, %35 : vector<8x128xi32>
    %37 = arith.ori %31, %36 : vector<8x128xi1>
    %cst_6 = arith.constant 0.000000e+00 : f32
    %38 = vector.broadcast %cst_6 : f32 to vector<8x128xf32>
    %39 = arith.maximumf %1, %38 : vector<8x128xf32>
    %40 = arith.mulf %39, %39 : vector<8x128xf32>
    %cst_7 = arith.constant 0.000000e+00 : f32
    %41 = vector.broadcast %cst_7 : f32 to vector<8x128xf32>
    %42 = arith.select %37, %40, %41 : vector<8x128xi1>, vector<8x128xf32>
    %cst_8 = arith.constant dense<0.000000e+00> : vector<8xf32>
    %43 = vector.multi_reduction <add>, %42, %cst_8 [1] : vector<8x128xf32> to vector<8xf32>
    %44 = vector.shape_cast %43 : vector<8xf32> to vector<8x1xf32>
    %45 = vector.extract_strided_slice %1 {offsets = [3, 0], sizes = [3, 1], strides = [1, 1]} : vector<8x128xf32> to vector<3x1xf32>
    %46 = vector.extract_strided_slice %44 {offsets = [0, 0], sizes = [3, 1], strides = [1, 1]} : vector<8x1xf32> to vector<3x1xf32>
    %47 = arith.subf %46, %45 : vector<3x1xf32>
    %48 = arith.mulf %47, %47 : vector<3x1xf32>
    %49 = vector.shape_cast %48 : vector<3x1xf32> to vector<1x3x1xf32>
    %cst_9 = arith.constant dense<0.000000e+00> : vector<1xf32>
    %50 = vector.multi_reduction <add>, %49, %cst_9 [1, 2] : vector<1x3x1xf32> to vector<1xf32>
    %51 = vector.shape_cast %50 : vector<1xf32> to vector<1x1x1xf32>
    %52 = vector.extract %51[0, 0, 0] : f32 from vector<1x1x1xf32>
    %53 = vector.broadcast %52 : f32 to vector<1x1xf32>
    %54 = tpu.iota {dimensions = array<i32: 0>} : vector<8x128xi32>
    %c3_i32 = arith.constant 3 : i32
    %55 = vector.broadcast %c3_i32 : i32 to vector<8x128xi32>
    %56 = arith.cmpi slt, %54, %55 : vector<8x128xi32>
    %c3_i32_10 = arith.constant 3 : i32
    %57 = vector.broadcast %c3_i32_10 : i32 to vector<8x128xi32>
    %58 = arith.cmpi eq, %54, %57 : vector<8x128xi32>
    %cst_11 = arith.constant 0.000000e+00 : f32
    %59 = vector.shape_cast %53 : vector<1x1xf32> to vector<1x1xf32>
    %60 = vector.broadcast %59 : vector<1x1xf32> to vector<8x128xf32>
    %61 = vector.broadcast %cst_11 : f32 to vector<8x128xf32>
    %62 = arith.select %58, %60, %61 : vector<8x128xi1>, vector<8x128xf32>
    %63 = vector.shape_cast %44 : vector<8x1xf32> to vector<8x1xf32>
    %64 = vector.broadcast %63 : vector<8x1xf32> to vector<8x128xf32>
    %65 = arith.select %56, %64, %62 : vector<8x128xi1>, vector<8x128xf32>
    %c0_12 = arith.constant 0 : index
    %c0_13 = arith.constant 0 : index
    %c0_14 = arith.constant 0 : index
    %66 = vector.load %arg2[%c0_12, %c0_13, %c0_14] : memref<1x8x128xf32, #tpu.memory_space<vmem>>, vector<1x8x128xf32>
    %67 = vector.shape_cast %66 : vector<1x8x128xf32> to vector<8x128xf32>
    %68 = vector.shape_cast %65 : vector<8x128xf32> to vector<1x8x128xf32>
    tpu.vector_store %arg2[%c0_12, %c0_13, %c0_14], %68 {strides = array<i32>} : memref<1x8x128xf32, #tpu.memory_space<vmem>>, vector<1x8x128xf32>,
    return
  }
  func.func @transform_0(%arg0: i32) -> (i32, i32, i32) {
    %c0_i32 = arith.constant 0 : i32
    %c0_i32_0 = arith.constant 0 : i32
    %c0_i32_1 = arith.constant 0 : i32
    return %arg0, %c0_i32, %c0_i32_0 : i32, i32, i32
  }
  func.func @transform_1(%arg0: i32) -> (i32, i32, i32) {
    %c0_i32 = arith.constant 0 : i32
    %c0_i32_0 = arith.constant 0 : i32
    %c0_i32_1 = arith.constant 0 : i32
    return %arg0, %c0_i32, %c0_i32_0 : i32, i32, i32
  }
}

</mosaic_0001>

<bundles_post_ra>
// kernel: tpu_custom_call.1
= control target key start
LH: loop header
LB: loop body
LE: loop exit
PB: predicated region body
PF: predicated region fallthrough
CT: control target
= control target key end

     0   :  { %6 = vsyncpa [#allocation3], 0  ;;  %s264_s0 = inlined_call_operand.hbm [shape: f32[1,8,128], index: 0, kind: input, shape index: {}]   ;;  %s265_s1 = inlined_call_operand.hbm [shape: f32[1,8,128], index: 1, kind: output, shape index: {}]  }
   0x1   :  { %7 = vsyncpa [#allocation4], 0  ;;  %s205_s6 = smov [#allocation2]   ;;  %s157_s10 = scalar_lea.hbm %s264_s0, 128 }
   0x2   :  { %s14_s7 = sshll.u32 %s205_s6, 4  ;;  %p158_p0 = scmp.ne.s32.totalorder %s264_s0, %s157_s10  ;;  %s15_s7 = int_to_ptr.vmem [resolvable:$true] %s14_s7 }
   0x3   :  { %p161_p1 = scmp.lt.u32.totalorder %s157_s10, %s264_s0 }
   0x5   :  { %p163_p2 = pnand %p161_p1, %p158_p0 }
   0x7   :  { %166 = shalt.err (!%p163_p2)
}
   0x8   :  { %s167_s15 = scalar_lea.vmem %s15_s7, 128  ;;  %p172_p4 = scmp.lt.s32.totalorder %s15_s7, %s15_s7 }
   0x9   :  { %p168_p3 = scmp.ne.s32.totalorder %s15_s7, %s167_s15  ;;  %p173_p5 = scmp.lt.s32.totalorder %s167_s15, %s167_s15 }
   0xb   :  { %p174_p6 = por %p173_p5, %p172_p4 }
   0xd   :  { %p175_p7 = pnand %p174_p6, %p168_p3 }
   0xf   :  { %178 = shalt.err (!%p175_p7)
}
  0x10   :  { %17 = dma.hbm_to_vmem [thread:$0]  %s264_s0, 128, %s15_s7, [#allocation3]  }
  0x11   :  { %201 = dma.done.wait [#allocation3], 128  }
  0x12   :  { %202 = vsyncadd [#allocation3], 4294967168  ;;  %v22_v0 = vlaneseq  ;;  %v230_v2 = vld [vmem:[#allocation2] sm:$0xff]  ;;  %vm119_vm14 = vcmask 2048   ;;  %s206_s0 = smov [#allocation5]  }
  0x13   :  { %v25_v3 = vand.u32 4294967168, %v230_v2  ;;  %v110_v62 = vmax.f32 %v230_v2, 0.0  ;;  %s144_s18 = sshll.u32 %s206_s0, 4  ;;  %s145_s18 = int_to_ptr.vmem [resolvable:$true] %s144_s18 }
  0x14   :  { %v23_v1 = vand.u32 127, %v22_v0  ;;  %s179_s20 = scalar_lea.vmem %s145_s18, 128  ;;  %p184_p9 = scmp.lt.s32.totalorder %s145_s18, %s145_s18 }
  0x15   :  { %p180_p8 = scmp.ne.s32.totalorder %s145_s18, %s179_s20  ;;  %p185_p10 = scmp.lt.s32.totalorder %s179_s20, %s179_s20 }
  0x16   :  { %v26_v4 = vor.u32 %v25_v3, %v23_v1 }
  0x17   :  { %p186_p11 = por %p185_p10, %p184_p9 }
  0x18   :  { %v28_v5 = vshra.s32 %v26_v4, 16  ;;  %v27_v7 = vand.u32 65535, %v26_v4 }
  0x19   :  { %p187_p12 = pnand %p186_p11, %p180_p8 }
  0x1a   :  { %v30_v6 = vcvt.s32.f32 %v28_v5  ;;  %v29_v8 = vcvt.s32.f32 %v27_v7  ;;  %v111_v5 = vmul.f32 %v110_v62, %v110_v62  ;;  %v115_v7 = vrot.slane %v230_v2, 3 }
  0x1c   :  { %31 = vmax.xlane.f32.xlu0 %v30_v6 }
  0xa9   :  { %v32_v9 = vpop.xlane.xlu0 %31 }
  0xaa   :  { %vm33_vm0 = vcmp.eq.f32.partialorder %v30_v6, %v32_v9  ;;  %v38_v11 = vcvt.f32.s32 %v32_v9 }
  0xab   :  { %v34_v10 = vsel %vm33_vm0, %v29_v8, -inf }
  0xac   :  { %35 = vmax.xlane.f32.xlu0 %v34_v10  ;;  %v39_v13 = vshll.u32 %v38_v11, 16 }
 0x139   :  { %v36_v12 = vpop.xlane.xlu0 %35 }
 0x13a   :  { %v37_v14 = vcvt.f32.s32 %v36_v12 }
 0x13c   :  { %v40_v15 = vadd.s32 %v39_v13, %v37_v14 }
 0x13e   :  { %vm41_vm1 = vcmp.eq.s32.totalorder %v26_v4, %v40_v15 }
 0x13f   :  { %v42_v16 = vsel %vm41_vm1, 2147483648, %v26_v4 }
 0x140   :  { %v44_v17 = vshra.s32 %v42_v16, 16  ;;  %v43_v19 = vand.u32 65535, %v42_v16 }
 0x142   :  { %v46_v18 = vcvt.s32.f32 %v44_v17  ;;  %v45_v21 = vcvt.s32.f32 %v43_v19  ;;  %v131_v19 = vshrl.u32 %v22_v0, 7 }
 0x144   :  { %47 = vmax.xlane.f32.xlu1 %v46_v18  ;;  %vm133_vm15 = vcmp.eq.s32.totalorder %v131_v19, 3  ;;  %vm132_vm0 = vcmp.lt.s32.totalorder %v131_v19, 3 }
 0x1d1   :  { %v48_v20 = vpop.xlane.xlu1 %47 }
 0x1d2   :  { %vm49_vm2 = vcmp.eq.f32.partialorder %v46_v18, %v48_v20  ;;  %v54_v23 = vcvt.f32.s32 %v48_v20 }
 0x1d3   :  { %v50_v22 = vsel %vm49_vm2, %v45_v21, -inf }
 0x1d4   :  { %51 = vmax.xlane.f32.xlu1 %v50_v22  ;;  %v55_v25 = vshll.u32 %v54_v23, 16 }
 0x261   :  { %v52_v24 = vpop.xlane.xlu1 %51 }
 0x262   :  { %v53_v26 = vcvt.f32.s32 %v52_v24 }
 0x264   :  { %v56_v27 = vadd.s32 %v55_v25, %v53_v26 }
 0x266   :  { %vm57_vm3 = vcmp.eq.s32.totalorder %v42_v16, %v56_v27 }
 0x267   :  { %v59_v28 = vsel %vm57_vm3, 2147483648, %v42_v16  ;;  %vm58_vm6 = vmor %vm41_vm1, %vm57_vm3 }
 0x268   :  { %v61_v29 = vshra.s32 %v59_v28, 16  ;;  %v60_v31 = vand.u32 65535, %v59_v28 }
 0x26a   :  { %v63_v30 = vcvt.s32.f32 %v61_v29  ;;  %v62_v33 = vcvt.s32.f32 %v60_v31 }
 0x26c   :  { %64 = vmax.xlane.f32.xlu0 %v63_v30 }
 0x2f9   :  { %v65_v32 = vpop.xlane.xlu0 %64 }
 0x2fa   :  { %vm66_vm4 = vcmp.eq.f32.partialorder %v63_v30, %v65_v32  ;;  %v71_v35 = vcvt.f32.s32 %v65_v32 }
 0x2fb   :  { %v67_v34 = vsel %vm66_vm4, %v62_v33, -inf }
 0x2fc   :  { %68 = vmax.xlane.f32.xlu1 %v67_v34  ;;  %v72_v37 = vshll.u32 %v71_v35, 16 }
 0x389   :  { %v69_v36 = vpop.xlane.xlu1 %68 }
 0x38a   :  { %v70_v38 = vcvt.f32.s32 %v69_v36 }
 0x38c   :  { %v73_v39 = vadd.s32 %v72_v37, %v70_v38 }
 0x38e   :  { %vm74_vm5 = vcmp.eq.s32.totalorder %v59_v28, %v73_v39 }
 0x38f   :  { %v76_v40 = vsel %vm74_vm5, 2147483648, %v59_v28  ;;  %vm237_vm7 = vmor %vm58_vm6, %vm74_vm5 }
 0x390   :  { %v78_v42 = vshra.s32 %v76_v40, 16  ;;  %v77_v44 = vand.u32 65535, %v76_v40 }
 0x392   :  { %v80_v43 = vcvt.s32.f32 %v78_v42  ;;  %v79_v46 = vcvt.s32.f32 %v77_v44 }
 0x394   :  { %81 = vmax.xlane.f32.xlu0 %v80_v43 }
 0x421   :  { %v82_v45 = vpop.xlane.xlu0 %81 }
 0x422   :  { %vm83_vm8 = vcmp.eq.f32.partialorder %v80_v43, %v82_v45  ;;  %v88_v48 = vcvt.f32.s32 %v82_v45 }
 0x423   :  { %v84_v47 = vsel %vm83_vm8, %v79_v46, -inf }
 0x424   :  { %85 = vmax.xlane.f32.xlu1 %v84_v47  ;;  %v89_v50 = vshll.u32 %v88_v48, 16 }
 0x4b1   :  { %v86_v49 = vpop.xlane.xlu1 %85 }
 0x4b2   :  { %v87_v51 = vcvt.f32.s32 %v86_v49 }
 0x4b4   :  { %v90_v52 = vadd.s32 %v89_v50, %v87_v51 }
 0x4b6   :  { %vm91_vm9 = vcmp.eq.s32.totalorder %v76_v40, %v90_v52 }
 0x4b7   :  { %v93_v53 = vsel %vm91_vm9, 2147483648, %v76_v40  ;;  %vm243_vm10 = vmor %vm237_vm7, %vm91_vm9 }
 0x4b8   :  { %v95_v55 = vshra.s32 %v93_v53, 16  ;;  %v94_v57 = vand.u32 65535, %v93_v53 }
 0x4ba   :  { %v97_v56 = vcvt.s32.f32 %v95_v55  ;;  %v96_v59 = vcvt.s32.f32 %v94_v57 }
 0x4bc   :  { %98 = vmax.xlane.f32.xlu0 %v97_v56 }
 0x549   :  { %v99_v58 = vpop.xlane.xlu0 %98 }
 0x54a   :  { %vm100_vm11 = vcmp.eq.f32.partialorder %v97_v56, %v99_v58  ;;  %v105_v61 = vcvt.f32.s32 %v99_v58 }
 0x54b   :  { %v101_v60 = vsel %vm100_vm11, %v96_v59, -inf }
 0x54c   :  { %102 = vmax.xlane.f32.xlu1 %v101_v60  ;;  %v106_v1 = vshll.u32 %v105_v61, 16 }
 0x5d9   :  { %v103_v63 = vpop.xlane.xlu1 %102 }
 0x5da   :  { %v104_v3 = vcvt.f32.s32 %v103_v63 }
 0x5dc   :  { %v107_v4 = vadd.s32 %v106_v1, %v104_v3 }
 0x5de   :  { %vm108_vm12 = vcmp.eq.s32.totalorder %v93_v53, %v107_v4 }
 0x5df   :  { %vm109_vm13 = vmor %vm243_vm10, %vm108_vm12 }
 0x5e0   :  { %v112_v6 = vsel %vm109_vm13, %v111_v5, 0.0 }
 0x5e1   :  { %113 = vadd.xlane.f32.xlu0 %v112_v6 }
 0x66e   :  { %v114_v8 = vpop.xlane.xlu0 %113 }
 0x66f   :  { %v117_v9 = vsub.f32 %v114_v8, %v115_v7 }
 0x671   :  { %v118_v10 = vmul.f32 %v117_v9, %v117_v9 }
 0x673   :  { %v120_v11 = vsel %vm119_vm14, %v118_v10, 0.0 }
 0x674   :  { %121 = vadd.xlane.f32.xlu1 %v120_v11 }
 0x701   :  { %v122_v12 = vpop.xlane.xlu1 %121 }
 0x702   :  { %v123_v13 = vrot.slane %v122_v12, 4 }
 0x704   :  { %v124_v14 = vadd.f32 %v123_v13, %v122_v12 }
 0x706   :  { %v125_v15 = vrot.slane %v124_v14, 2 }
 0x708   :  { %v126_v16 = vadd.f32 %v125_v15, %v124_v14 }
 0x70a   :  { %v127_v17 = vrot.slane %v126_v16, 1 }
 0x70c   :  { %v128_v18 = vadd.f32 %v127_v17, %v126_v16 }
 0x70e   :  { %153 = vpush %v128_v18 }
 0x73f   :  { %s154_s19 = spop %153 }
 0x740   :  { %v134_v2 = vstv %s154_s19 }
 0x741   :  { %v135_v20 = vsel %vm133_vm15, %v134_v2, 0.0 }
 0x742   :  { %v136_v21 = vsel %vm132_vm0, %v114_v8, %v135_v20 }
 0x743   :  { %137 = vst [vmem:[#allocation5] sm:$0xff] %v136_v21 }
 0x744   :  { %190 = shalt.err (!%p187_p12)
}
 0x745   :  { %s191_s23 = scalar_lea.hbm %s265_s1, 128 }
 0x746   :  { %p192_p13 = scmp.ne.s32.totalorder %s265_s1, %s191_s23  ;;  %p195_p0 = scmp.lt.u32.totalorder %s191_s23, %s265_s1 }
 0x748   :  { %p197_p1 = pnand %p195_p0, %p192_p13 }
 0x74a   :  { %200 = shalt.err (!%p197_p1)
}
 0x74b   :  { %147 = dma.vmem_to_hbm [thread:$0]  %s145_s18, 128, %s265_s1, [#allocation4]  }
 0x74c   :  { %203 = dma.done.wait [#allocation4], 128  }
 0x74d   :  { %204 = vsyncadd [#allocation4], 4294967168 }
 0x74e   :  { %151 = vsyncpa [#allocation3], 1 }
 0x74f   :  { %152 = vsyncpa [#allocation4], 1 }

</bundles_post_ra>
